<compile_context>
chip_gen: v5e
topology: v5e:2x2
jax: 0.10.0
libtpu: 0.0.40
codegen_flags: <defaults>
</compile_context>

<pallas_src>
import jax
import jax.numpy as jnp
from jax.experimental import pallas as pl
from jax.experimental.pallas import tpu as pltpu


def _bbox_head_kernel(x_ref, w_ref, b_ref, o_ref):
    # x_ref: (C, tpix)     pixel tile, pixels on the lane axis
    # w_ref: (Cout, C)     full 1x1-conv weight (channel matmul)
    # b_ref: (Cout, 1)     bias, broadcast along lanes
    # o_ref: (Cout, tpix)
    acc = jnp.dot(w_ref[...], x_ref[...], preferred_element_type=jnp.float32)
    acc = acc + b_ref[...].astype(jnp.float32)
    o_ref[...] = acc.astype(o_ref.dtype)


def bbox_head_forward(x_nchw, weight, bias, num_anchors, tpix_max=2048):
    """x_nchw: (N, C, H, W); weight: (Cout, C) from Conv2d (Cout, C, 1, 1); bias: (Cout,)."""
    N, C, H, W = x_nchw.shape
    Cout = weight.shape[0]
    assert Cout == num_anchors * 4

    HW = H * W
    LANE = 128
    # Pixel tile: as large as possible (up to tpix_max), 128-aligned.
    hw_128 = ((HW + LANE - 1) // LANE) * LANE
    tpix = min(tpix_max, hw_128)
    # Pad the pixel axis up to a multiple of the tile so the grid divides evenly
    # (robust for arbitrary N*H*W; padded columns are sliced off afterwards).
    HWp = ((HW + tpix - 1) // tpix) * tpix

    # Glue: NCHW -> (N, C, H*W) is free (H*W already contiguous). No input transpose.
    x_flat = x_nchw.reshape(N, C, HW)
    if HWp != HW:
        x_flat = jnp.pad(x_flat, ((0, 0), (0, 0), (0, HWp - HW)))

    w_mat = weight                      # (Cout, C)
    b_mat = bias.reshape(Cout, 1)       # (Cout, 1)

    grid = (N, HWp // tpix)             # both axes independent -> parallel (>=2 steps)

    out_cm = pl.pallas_call(
        _bbox_head_kernel,
        out_shape=jax.ShapeDtypeStruct((N, Cout, HWp), x_nchw.dtype),
        grid_spec=pltpu.PrefetchScalarGridSpec(
            num_scalar_prefetch=0,
            grid=grid,
            in_specs=[
                # batch dim squeezed out of the kernel view
                pl.BlockSpec((None, C, tpix), lambda n, i: (n, 0, i)),
                pl.BlockSpec((Cout, C), lambda n, i: (0, 0)),
                pl.BlockSpec((Cout, 1), lambda n, i: (0, 0)),
            ],
            out_specs=pl.BlockSpec((None, Cout, tpix), lambda n, i: (n, 0, i)),
        ),
        compiler_params=pltpu.CompilerParams(
            dimension_semantics=("parallel", "parallel")),
    )(x_flat, w_mat, b_mat)

    # Drop pixel padding, then permute the small 12-channel output:
    # (N, Cout, H*W) -> (N, H*W, Cout) -> (N, H*W*A, 4)
    # (matches PyTorch permute(0,2,3,1).contiguous().view(N, -1, 4))
    out_cm = out_cm[:, :, :HW]
    out = jnp.transpose(out_cm, (0, 2, 1)).reshape(N, HW * num_anchors, 4)
    return out


if __name__ == "__main__":
    key = jax.random.PRNGKey(0)
    k_x, k_w, k_b = jax.random.split(key, 3)

    # Small shapes consistent with the module: inchannels=16, num_anchors=3
    N, C, H, W = 2, 16, 16, 16
    num_anchors = 3
    Cout = num_anchors * 4

    x = jax.random.normal(k_x, (N, C, H, W), dtype=jnp.float32)
    weight = jax.random.normal(k_w, (Cout, C), dtype=jnp.float32) * 0.05
    bias = jax.random.normal(k_b, (Cout,), dtype=jnp.float32) * 0.01

    out = bbox_head_forward(x, weight, bias, num_anchors)
    out = jax.block_until_ready(out)

    # Pure-JAX reference of the same semantics (1x1 conv, NCHW -> NHWC -> view)
    ref = jnp.einsum("nchw,oc->nhwo", x, weight) + bias
    ref = ref.reshape(N, H * W * num_anchors, 4)
    assert out.shape == (N, H * W * num_anchors, 4)
    assert jnp.allclose(out, ref, atol=1e-5, rtol=1e-5)

    print("KERNEL_OK")
</pallas_src>

<mosaic_0001>
module attributes {stable_mosaic.version = 11 : i64} {
  func.func @_bbox_head_kernel(%arg0: i32, %arg1: i32, %arg2: memref<1x16x256xf32, #tpu.memory_space<vmem>>, %arg3: memref<12x16xf32, #tpu.memory_space<vmem>>, %arg4: memref<12x1xf32, #tpu.memory_space<vmem>>, %arg5: memref<1x12x256xf32, #tpu.memory_space<vmem>>) attributes {dimension_semantics = [#tpu.dimension_semantics<parallel>, #tpu.dimension_semantics<parallel>], iteration_bounds = array<i64: 2, 1>, scalar_prefetch = 0 : i64, scratch_operands = 0 : i64, tpu.core_type = #tpu.core_type<tc>, window_params = [{transform_indices = @transform_0, window_bounds = array<i64: 1, 16, 256>}, {pipeline_mode = #tpu.pipeline_mode<synchronous>, transform_indices = @transform_1, window_bounds = array<i64: 12, 16>}, {pipeline_mode = #tpu.pipeline_mode<synchronous>, transform_indices = @transform_2, window_bounds = array<i64: 12, 1>}, {transform_indices = @transform_3, window_bounds = array<i64: 1, 12, 256>}]} {
    %c0 = arith.constant 0 : index
    %c0_0 = arith.constant 0 : index
    %0 = vector.load %arg3[%c0, %c0_0] : memref<12x16xf32, #tpu.memory_space<vmem>>, vector<12x16xf32>
    %c0_1 = arith.constant 0 : index
    %c0_2 = arith.constant 0 : index
    %c0_3 = arith.constant 0 : index
    %1 = vector.load %arg2[%c0_1, %c0_2, %c0_3] : memref<1x16x256xf32, #tpu.memory_space<vmem>>, vector<1x16x256xf32>
    %2 = vector.shape_cast %1 : vector<1x16x256xf32> to vector<16x256xf32>
    %cst = arith.constant dense<0.000000e+00> : vector<12x256xf32>
    %3 = tpu.matmul %0, %2, %cst {dimension_numbers = #tpu.dot_dimension_numbers<[1], [0], [0], [1], [0, 0, 1, 1], [], []>} : vector<12x16xf32>, vector<16x256xf32>, vector<12x256xf32> -> vector<12x256xf32>
    %c0_4 = arith.constant 0 : index
    %c0_5 = arith.constant 0 : index
    %4 = vector.load %arg4[%c0_4, %c0_5] : memref<12x1xf32, #tpu.memory_space<vmem>>, vector<12x1xf32>
    %5 = vector.broadcast %4 : vector<12x1xf32> to vector<12x256xf32>
    %6 = arith.addf %3, %5 : vector<12x256xf32>
    %c0_6 = arith.constant 0 : index
    %c0_7 = arith.constant 0 : index
    %c0_8 = arith.constant 0 : index
    %7 = vector.load %arg5[%c0_6, %c0_7, %c0_8] : memref<1x12x256xf32, #tpu.memory_space<vmem>>, vector<1x12x256xf32>
    %8 = vector.shape_cast %7 : vector<1x12x256xf32> to vector<12x256xf32>
    %9 = vector.shape_cast %6 : vector<12x256xf32> to vector<1x12x256xf32>
    tpu.vector_store %arg5[%c0_6, %c0_7, %c0_8], %9 {strides = array<i32>} : memref<1x12x256xf32, #tpu.memory_space<vmem>>, vector<1x12x256xf32>,
    return
  }
  func.func @transform_0(%arg0: i32, %arg1: i32) -> (i32, i32, i32) {
    %c0_i32 = arith.constant 0 : i32
    %c0_i32_0 = arith.constant 0 : i32
    return %arg0, %c0_i32, %arg1 : i32, i32, i32
  }
  func.func @transform_1(%arg0: i32, %arg1: i32) -> (i32, i32) {
    %c0_i32 = arith.constant 0 : i32
    %c0_i32_0 = arith.constant 0 : i32
    %c0_i32_1 = arith.constant 0 : i32
    return %c0_i32, %c0_i32_0 : i32, i32
  }
  func.func @transform_2(%arg0: i32, %arg1: i32) -> (i32, i32) {
    %c0_i32 = arith.constant 0 : i32
    %c0_i32_0 = arith.constant 0 : i32
    %c0_i32_1 = arith.constant 0 : i32
    return %c0_i32, %c0_i32_0 : i32, i32
  }
  func.func @transform_3(%arg0: i32, %arg1: i32) -> (i32, i32, i32) {
    %c0_i32 = arith.constant 0 : i32
    %c0_i32_0 = arith.constant 0 : i32
    return %arg0, %c0_i32, %arg1 : i32, i32, i32
  }
}

</mosaic_0001>

<bundles_post_ra>
// kernel: tpu_custom_call.1
= control target key start
LH: loop header
LB: loop body
LE: loop exit
PB: predicated region body
PF: predicated region fallthrough
CT: control target
= control target key end

     0   :  { %8 = vsyncpa [#allocation3], 0  ;;  %s678_s0 = inlined_call_operand.hbm [shape: f32[2,16,256], index: 0, kind: input, shape index: {}]   ;;  %s679_s1 = inlined_call_operand.vmem [shape: f32[12,16], index: 1, kind: input, shape index: {}]   ;;  %s680_s2 = inlined_call_operand.vmem [shape: f32[12,1], index: 2, kind: input, shape index: {}]   ;;  %s681_s3 = inlined_call_operand.vmem [shape: f32[2,12,256], index: 3, kind: output, shape index: {}]  }
   0x1   :  { %10 = vsyncpa [#allocation3 + $0x1], 0  ;;  %s578_s12 = smov 0   ;;  %s580_s13 = smov 0  }
   0x2   :  { %s582_s14 = smov 0   ;;  %s584_s15 = smov 0  }
   0x3   :  { %s586_s16 = smov 0   ;;  %s588_s17 = smov 0  }
   0x4 LB: > { %s391_s18 = sadd.s32 4294967295, %s553_s17   ;;  %s28_s19 = sadd.s32 1, %s549_s16  ;;  %s553_s17 = sphi %s588_s17, %s16_s17   ;;  %s549_s16 = sphi %s586_s16, %s688_s16   ;;  %s545_s15 = sphi %s584_s15, %s687_s15   ;;  %s541_s14 = sphi %s582_s14, %s686_s14   ;;  %s537_s13 = sphi %s580_s13, %s685_s13   ;;  %s533_s12 = sphi %s578_s12, %s684_s12  }
   0x5   : > { %p30_p0 = scmp.ge.s32.totalorder %s28_s19, 2  ;;  %s37_s20 = sadd.s32 1, %s541_s14 }
   0x6   : > { %p44_p1 = scmp.ne.s32.totalorder %s541_s14, %s537_s13  ;;  %p45_p2 = scmp.eq.s32.totalorder %s553_s17, 0 }
   0x7   : > { %s690_s19 = smov (%p30_p0, %s28_s19), 0  ;;  %p50_p4 = scmp.ne.s32.totalorder %s537_s13, %s533_s12 }
   0x8   : > { %p614_p3 = por %p45_p2, %p44_p1  ;;  %s32_s22 = ssub.s32 %s549_s16, %s690_s19 }
   0x9   : > { %p51_p5 = scmp.eq.s32.totalorder %s391_s18, 0  ;;  %p35_p6 = scmp.eq.s32.totalorder %s32_s22, 0 }
   0xa   : > { %p420_p8 = scmp.lt.s32.totalorder %s553_s17, 2  ;;  %s150_s25 = sand.u32 1, %s541_s14  }
   0xb   : > { %p621_p7 = por %p51_p5, %p50_p4  ;;  %s408_s26 = sshll.u32 %s549_s16, 5 }
   0xc   : > { %s627_s24 = scalar_select %p35_p6, %s541_s14, %s37_s20  }
   0xd   : > { %s395_s27 = sshll.u32 %s150_s25, 5  ;;  %s161_s30 = scalar_lea.hbm %s678_s0, %s408_s26 }
   0xe   : > { %s162_s4 = sshll.u32 %s161_s30, 4  ;;  %s154_s5 = scalar_lea.vmem [#allocation2], %s395_s27  ;;  %s163_s4 = int_to_ptr.hbm [resolvable:$true] %s162_s4 }
   0xf   : > { %s164_s6 = sshll.u32 %s154_s5, 4  ;;  %p417_p9 = pnand %p420_p8, %p614_p3  ;;  %s165_s6 = int_to_ptr.vmem [resolvable:$true] %s164_s6 }
  0x10   : > { %p398_p10 = scmp.ge.s32.totalorder %s553_s17, 1  ;;  %p172_p11 = scmp.lt.s32.totalorder %s553_s17, 3 }
  0x11   : > { %s151_s7 = scalar_lea.sflag [#allocation3], %s150_s25  ;;  %s555_s8 = smov 256  }
  0x12   : > { %s556_s9 = smov 16   ;;  %p173_p12 = pnand %p398_p10, %p172_p11 }
  0x13   : > { %419 = dma.hbm_to_vmem [thread:$0]  (!%p417_p9), %s163_s4, 512, %s165_s6, %s151_s7, %s555_s8, %s555_s8, %s556_s9  }
  0x14   : > { %176 = sbr.rel (%p173_p12) target bundleno = 168 (0xa8), region = 32  ;;  %s178_s10 = sand.u32 (!%p173_p12), 1, %s537_s13  }
  0x15   : > { %s399_s11 = sshll.u32 (!%p173_p12), %s178_s10, 5  ;;  %s179_s12 = scalar_lea.sflag (!%p173_p12), [#allocation3], %s178_s10 }
  0x16   : > { %s182_s18 = scalar_lea.vmem (!%p173_p12), [#allocation2], %s399_s11 }
  0x19   : > { %528 = dma.done.wait (%p621_p7), %s179_s12, 512  }
  0x1a   : > { %530 = vsyncadd (%p621_p7), %s179_s12, 4294966784  ;;  %v557_v0 = vmov 0   ;;  %v225_v1 = vld [vmem:[%s182_s18 + $0x10] sm:$0xff]  ;;  %v226_v2 = vld [vmem:[%s182_s18 + $0x18] sm:$0xff]  ;;  %vm239_vm0 = vcmask 130048   ;;  %p212_p13 = scmp.lt.s32.totalorder %s545_s15, 1 }
  0x1b   : > { %472 = vset.pattern.permute.xlu0 %v557_v0  ;;  %v223_v3 = vld [vmem:[%s182_s18] sm:$0xff]  ;;  %260 = vmatpush.msra.mxu0 %v225_v1  ;;  %v224_v4 = vld [vmem:[%s182_s18 + $0x8] sm:$0xff] }
  0x1c   : > { %410 = vmatpush.msra.mxu2 %v225_v1  ;;  %283 = vmatpush.msra.mxu1 %v226_v2  ;;  %v221_v5 = vld [vmem:[%s679_s1] sm:$0xff]  ;;  %v222_v6 = vld [vmem:[%s679_s1 + $0x8] sm:$0xf]  ;;  %s692_s15 = smov (!%p212_p13, %s545_s15), 1 }
  0x1d   : > { %412 = vmatpush.msra.mxu3 %v226_v2  ;;  %261 = vmatpush.msra.mxu0 %v223_v3  ;;  %v227_v7 = vld [vmem:[%s680_s2] sm:$0xff]  ;;  %v228_v8 = vld [vmem:[%s680_s2 + $0x8] sm:$0xf]  ;;  %s409_s29 = sshll.u32 %s692_s15, 5 }
  0x1e   : > { %411 = vmatpush.msra.mxu2 %v223_v3  ;;  %284 = vmatpush.msra.mxu1 %v224_v4  ;;  %s219_s5 = scalar_lea.vmem %s681_s3, %s409_s29 }
  0x1f   : > { %413 = vmatpush.msra.mxu3 %v224_v4  ;;  %402 = vmatmul.msk.f32.vlgmr.msra.gmra.mxu0 %vm239_vm0, %v221_v5 }
  0x20   : > { %403 = vmatmul.msk.f32.vlgmr.msra.gmra.mxu2 %vm239_vm0, %v222_v6  ;;  %404 = vmatmul.msk.f32.vlgmr.msra.gmra.mxu1 %vm239_vm0, %v221_v5 }
  0x21   : > { %405 = vmatmul.msk.f32.vlgmr.msra.gmra.mxu3 %vm239_vm0, %v222_v6  ;;  %231 = vperm.xlu0 %472, %v227_v7  }
  0x29   : > { %236 = vperm.xlu0 %472, %v228_v8  }
  0x93   : > { %v232_v9 = vpop.permute.xlu0 %231 }
  0x9b   : > { %v237_v14 = vpop.permute.xlu0 %236 }
  0x9c   : > { %v263_v10 = vpop.f32.mrf.mxu0 }
  0x9d   : > { %v264_v11 = vadd.f32 %v263_v10, %v232_v9  ;;  %v286_v12 = vpop.f32.mrf.mxu1 }
  0x9e   : > { %v287_v13 = vadd.f32 %v286_v12, %v232_v9 }
  0x9f   : > { %292 = vst [vmem:[%s219_s5] sm:$0xff] %v264_v11 }
  0xa0   : > { %293 = vst [vmem:[%s219_s5 + $0x8] sm:$0xff] %v287_v13 }
  0xa3   : > { %v266_v15 = vpop.f32.mrf.mxu2 }
  0xa4   : > { %v267_v16 = vadd.f32 %v266_v15, %v237_v14  ;;  %v289_v17 = vpop.f32.mrf.mxu3 }
  0xa5   : > { %v290_v18 = vadd.f32 %v289_v17, %v237_v14 }
  0xa6   : > { %294 = vst [vmem:[%s219_s5 + $0x10] sm:$0xf] %v267_v16 }
  0xa7   : > { %295 = vst [vmem:[%s219_s5 + $0x18] sm:$0xf] %v290_v18 }
  0xa8 PF: > { %s16_s17 = sadd.s32 1, %s553_s17   ;;  %s684_s12 = smov %s537_s13 }
  0xa9   : > { %p13_p0 = scmp.ge.s32.totalorder %s16_s17, 4   ;;  %s685_s13 = smov %s541_s14 }
  0xaa   : > { %s686_s14 = smov %s627_s24  ;;  %s687_s15 = smov %s549_s16 }
  0xab   : > { %s688_s16 = smov %s690_s19  ;;  %15 = sbr.rel (!%p13_p0) target bundleno = 4 (0x4), region = 72 }
  0xb0   :  { %326 = vsyncpa [#allocation3], 1 }
  0xb1   :  { %328 = vsyncpa [#allocation3 + $0x1], 1 }

</bundles_post_ra>
